<compile_context>
chip_gen: v6e
topology: v6e:2x2x1
jax: 0.10.0
libtpu: 0.0.40
codegen_flags: <defaults>
</compile_context>

<pallas_src>
import math

import jax
import jax.numpy as jnp
from jax.experimental import pallas as pl
from jax.experimental.pallas import tpu as pltpu

# Hyperparameters (match PyTorch __init__ defaults).
ENTROPY_WEIGHT = 0.05
TEMPERATURE = 1.0
NOISE_STD = 0.05
LABEL_SMOOTHING = 0.05

_LOG_ENT_EPS = math.log(1e-6)  # log of the entropy clamp floor


def _smoothed_param_loss_kernel(pred_ref, tgt_ref, noise_ref, out_ref):
    pred = pred_ref[...].astype(jnp.float32)     # (B, N)
    tgt = tgt_ref[...].astype(jnp.float32)       # (B, N)
    noise = noise_ref[...].astype(jnp.float32)   # (B, N)

    b = pred.shape[0]
    n = pred.shape[1]

    # ---- action_target = label-smoothed softmax(target / T, dim=-1) ----
    t = tgt * (1.0 / TEMPERATURE)                           # fold 1/T as a constant mul
    t = t - jnp.max(t, axis=-1, keepdims=True)
    et = jnp.exp(t)
    inv_sum_et = 1.0 / jnp.sum(et, axis=-1, keepdims=True)  # (B,1) divide only
    action_target = et * inv_sum_et                         # broadcast multiply (VPU)
    action_target = (1.0 - LABEL_SMOOTHING) * action_target + LABEL_SMOOTHING / n
    log_at = jnp.log(action_target)

    # ---- noisy logits: pred * (1 + N(0,1) * noise_std) ----
    noisy = pred * (1.0 + noise * NOISE_STD)

    # ---- temp_multiplier(pred): 2 * 10**(len(str(int(mean))) - 1) ----
    # Threshold-select chain instead of log10/pow (no scalar transcendentals
    # on the serial mean -> denom dependency, exact at powers of ten).
    mean_val = jnp.mean(pred)
    trunc = jnp.trunc(mean_val)
    abs_trunc = jnp.abs(trunc)
    pow10 = jnp.where(abs_trunc < 1e1, 1.0,
            jnp.where(abs_trunc < 1e2, 1e1,
            jnp.where(abs_trunc < 1e3, 1e2,
            jnp.where(abs_trunc < 1e4, 1e3,
            jnp.where(abs_trunc < 1e5, 1e4,
            jnp.where(abs_trunc < 1e6, 1e5,
            jnp.where(abs_trunc < 1e7, 1e6, 1e7)))))))
    # '-' sign counts as a character in len(str(int(x))); trunc(-0.x) == -0.0
    # compares False to < 0.0, matching Python's int() truncation toward zero.
    pow10 = jnp.where(trunc < 0.0, pow10 * 10.0, pow10)
    denom = jnp.maximum(TEMPERATURE * 2.0 * pow10, 0.01)
    inv_denom = 1.0 / denom                                 # scalar reciprocal

    # ---- noisy_action_pred = softmax(noisy / denom, dim=-1) ----
    s = noisy * inv_denom
    s = s - jnp.max(s, axis=-1, keepdims=True)
    es = jnp.exp(s)
    inv_sum_es = 1.0 / jnp.sum(es, axis=-1, keepdims=True)  # (B,1) divide only
    pred_probs = es * inv_sum_es

    # ---- KL (batchmean, PyTorch's +1e-8 kept) fused with entropy bonus ----
    log_p_eps = jnp.log(pred_probs + 1e-8)                  # exact F.kl_div parity
    safe_probs = jnp.maximum(pred_probs, 1e-6)
    # Reuse log_p_eps for the entropy term instead of a third full-vreg log;
    # clamping at log(1e-6) equals log(clamp(p,1e-6)) up to the 1e-8 epsilon.
    safe_log = jnp.maximum(log_p_eps, _LOG_ENT_EPS)

    # loss = KL - W*entropy
    #      = [ sum(at*(log_at - log_p)) + W * sum(sp*log_sp) ] / B
    combined = action_target * (log_at - log_p_eps) + ENTROPY_WEIGHT * (safe_probs * safe_log)
    out_ref[0, 0] = jnp.sum(combined) * (1.0 / b)


def smoothed_param_loss(predicted_rewards, target_rewards, noise, step_count=0):
    """predicted_rewards/target_rewards/noise: (B, N). Returns scalar loss."""
    del step_count  # unused in the PyTorch forward as well
    B, N = predicted_rewards.shape
    cost = pl.CostEstimate(
        flops=30 * B * N,
        transcendentals=4 * B * N,       # 2 exps + 2 logs over (B, N)
        bytes_accessed=3 * B * N * 4 + 4,
    )
    out = pl.pallas_call(
        _smoothed_param_loss_kernel,
        out_shape=jax.ShapeDtypeStruct((1, 1), jnp.float32),
        in_specs=[
            pl.BlockSpec(memory_space=pltpu.MemorySpace.VMEM),
            pl.BlockSpec(memory_space=pltpu.MemorySpace.VMEM),
            pl.BlockSpec(memory_space=pltpu.MemorySpace.VMEM),
        ],
        out_specs=pl.BlockSpec(memory_space=pltpu.MemorySpace.SMEM),
        cost_estimate=cost,
    )(predicted_rewards, target_rewards, noise)
    return out[0, 0]


if __name__ == "__main__":
    B, N = 8, 128  # batch x num_actions (softmax over last dim)
    key = jax.random.PRNGKey(0)
    k_pred, k_tgt, k_noise = jax.random.split(key, 3)

    predicted_rewards = jax.random.normal(k_pred, (B, N), dtype=jnp.float32) * 3.0 + 5.0
    target_rewards = jax.random.normal(k_tgt, (B, N), dtype=jnp.float32)
    noise = jax.random.normal(k_noise, (B, N), dtype=jnp.float32)  # randn_like surrogate

    loss = smoothed_param_loss(predicted_rewards, target_rewards, noise, step_count=0)
    jax.block_until_ready(loss)

    # Pure-JAX reference for sanity (same math as the PyTorch module).
    def ref(pred, tgt, nz):
        at = jax.nn.softmax(tgt / TEMPERATURE, axis=-1)
        at = (1.0 - LABEL_SMOOTHING) * at + LABEL_SMOOTHING / pred.shape[-1]
        noisy = pred * (1.0 + nz * NOISE_STD)
        m = float(jnp.mean(pred))
        num_digits = len(str(int(m)))
        denom = max(TEMPERATURE * 2 * 10 ** (num_digits - 1), 0.01)
        p = jax.nn.softmax(noisy / denom, axis=-1)
        kl = jnp.sum(at * (jnp.log(at) - jnp.log(p + 1e-8))) / pred.shape[0]
        sp = jnp.maximum(p, 1e-6)
        ent = jnp.mean(-jnp.sum(sp * jnp.log(sp), axis=-1))
        return kl - ENTROPY_WEIGHT * ent

    ref_loss = ref(predicted_rewards, target_rewards, noise)
    assert jnp.allclose(loss, ref_loss, rtol=5e-5, atol=5e-5), (loss, ref_loss)

    print("KERNEL_OK")
</pallas_src>

<mosaic_0001>
module attributes {stable_mosaic.version = 11 : i64} {
  func.func @_smoothed_param_loss_kernel(%arg0: memref<8x128xf32, #tpu.memory_space<vmem>>, %arg1: memref<8x128xf32, #tpu.memory_space<vmem>>, %arg2: memref<8x128xf32, #tpu.memory_space<vmem>>, %arg3: memref<1x1xf32, #tpu.memory_space<smem>>) attributes {dimension_semantics = [], scalar_prefetch = 0 : i64, scratch_operands = 0 : i64, tpu.core_type = #tpu.core_type<tc>} {
    %c0 = arith.constant 0 : index
    %c0_0 = arith.constant 0 : index
    %0 = vector.load %arg0[%c0, %c0_0] : memref<8x128xf32, #tpu.memory_space<vmem>>, vector<8x128xf32>
    %c0_1 = arith.constant 0 : index
    %c0_2 = arith.constant 0 : index
    %1 = vector.load %arg1[%c0_1, %c0_2] : memref<8x128xf32, #tpu.memory_space<vmem>>, vector<8x128xf32>
    %c0_3 = arith.constant 0 : index
    %c0_4 = arith.constant 0 : index
    %2 = vector.load %arg2[%c0_3, %c0_4] : memref<8x128xf32, #tpu.memory_space<vmem>>, vector<8x128xf32>
    %cst = arith.constant 1.000000e+00 : f32
    %3 = vector.broadcast %cst : f32 to vector<8x128xf32>
    %4 = arith.mulf %1, %3 : vector<8x128xf32>
    %cst_5 = arith.constant dense<0xFF800000> : vector<8xf32>
    %5 = vector.multi_reduction <maximumf>, %4, %cst_5 [1] : vector<8x128xf32> to vector<8xf32>
    %6 = vector.shape_cast %5 : vector<8xf32> to vector<8x1xf32>
    %7 = vector.broadcast %6 : vector<8x1xf32> to vector<8x128xf32>
    %8 = arith.subf %4, %7 : vector<8x128xf32>
    %9 = math.exp %8 : vector<8x128xf32>
    %cst_6 = arith.constant dense<0.000000e+00> : vector<8xf32>
    %10 = vector.multi_reduction <add>, %9, %cst_6 [1] : vector<8x128xf32> to vector<8xf32>
    %11 = vector.shape_cast %10 : vector<8xf32> to vector<8x1xf32>
    %cst_7 = arith.constant 1.000000e+00 : f32
    %12 = vector.broadcast %cst_7 : f32 to vector<8x1xf32>
    %13 = arith.divf %12, %11 : vector<8x1xf32>
    %14 = vector.broadcast %13 : vector<8x1xf32> to vector<8x128xf32>
    %15 = arith.mulf %9, %14 : vector<8x128xf32>
    %cst_8 = arith.constant 0.949999988 : f32
    %16 = vector.broadcast %cst_8 : f32 to vector<8x128xf32>
    %17 = arith.mulf %16, %15 : vector<8x128xf32>
    %cst_9 = arith.constant 3.906250e-04 : f32
    %18 = vector.broadcast %cst_9 : f32 to vector<8x128xf32>
    %19 = arith.addf %17, %18 : vector<8x128xf32>
    %20 = math.log %19 : vector<8x128xf32>
    %cst_10 = arith.constant 5.000000e-02 : f32
    %21 = vector.broadcast %cst_10 : f32 to vector<8x128xf32>
    %22 = arith.mulf %2, %21 : vector<8x128xf32>
    %cst_11 = arith.constant 1.000000e+00 : f32
    %23 = vector.broadcast %cst_11 : f32 to vector<8x128xf32>
    %24 = arith.addf %23, %22 : vector<8x128xf32>
    %25 = arith.mulf %0, %24 : vector<8x128xf32>
    %26 = vector.shape_cast %0 : vector<8x128xf32> to vector<1x8x128xf32>
    %cst_12 = arith.constant dense<0.000000e+00> : vector<1xf32>
    %27 = vector.multi_reduction <add>, %26, %cst_12 [1, 2] : vector<1x8x128xf32> to vector<1xf32>
    %28 = vector.shape_cast %27 : vector<1xf32> to vector<1x1x1xf32>
    %29 = vector.extract %28[0, 0, 0] : f32 from vector<1x1x1xf32>
    %cst_13 = arith.constant 1.024000e+03 : f32
    %30 = arith.divf %29, %cst_13 : f32
    %cst_14 = arith.constant 0.000000e+00 : f32
    %31 = arith.cmpf olt, %30, %cst_14 : f32
    %32 = math.ceil %30 : f32
    %33 = math.floor %30 : f32
    %34 = arith.select %31, %32, %33 : f32
    %35 = math.absf %34 : f32
    %cst_15 = arith.constant 1.000000e+01 : f32
    %36 = arith.cmpf olt, %35, %cst_15 : f32
    %cst_16 = arith.constant 1.000000e+02 : f32
    %37 = arith.cmpf olt, %35, %cst_16 : f32
    %cst_17 = arith.constant 1.000000e+03 : f32
    %38 = arith.cmpf olt, %35, %cst_17 : f32
    %cst_18 = arith.constant 1.000000e+04 : f32
    %39 = arith.cmpf olt, %35, %cst_18 : f32
    %cst_19 = arith.constant 1.000000e+05 : f32
    %40 = arith.cmpf olt, %35, %cst_19 : f32
    %cst_20 = arith.constant 1.000000e+06 : f32
    %41 = arith.cmpf olt, %35, %cst_20 : f32
    %cst_21 = arith.constant 1.000000e+07 : f32
    %42 = arith.cmpf olt, %35, %cst_21 : f32
    %cst_22 = arith.constant 1.000000e+06 : f32
    %cst_23 = arith.constant 1.000000e+07 : f32
    %43 = arith.select %42, %cst_22, %cst_23 : f32
    %cst_24 = arith.constant 1.000000e+05 : f32
    %44 = arith.select %41, %cst_24, %43 : f32
    %cst_25 = arith.constant 1.000000e+04 : f32
    %45 = arith.select %40, %cst_25, %44 : f32
    %cst_26 = arith.constant 1.000000e+03 : f32
    %46 = arith.select %39, %cst_26, %45 : f32
    %cst_27 = arith.constant 1.000000e+02 : f32
    %47 = arith.select %38, %cst_27, %46 : f32
    %cst_28 = arith.constant 1.000000e+01 : f32
    %48 = arith.select %37, %cst_28, %47 : f32
    %cst_29 = arith.constant 1.000000e+00 : f32
    %49 = arith.select %36, %cst_29, %48 : f32
    %cst_30 = arith.constant 0.000000e+00 : f32
    %50 = arith.cmpf olt, %34, %cst_30 : f32
    %cst_31 = arith.constant 1.000000e+01 : f32
    %51 = arith.mulf %49, %cst_31 : f32
    %52 = arith.select %50, %51, %49 : f32
    %cst_32 = arith.constant 2.000000e+00 : f32
    %53 = arith.mulf %cst_32, %52 : f32
    %cst_33 = arith.constant 0.00999999977 : f32
    %54 = arith.maximumf %53, %cst_33 : f32
    %cst_34 = arith.constant 1.000000e+00 : f32
    %55 = arith.divf %cst_34, %54 : f32
    %56 = vector.broadcast %55 : f32 to vector<8x128xf32>
    %57 = arith.mulf %25, %56 : vector<8x128xf32>
    %cst_35 = arith.constant dense<0xFF800000> : vector<8xf32>
    %58 = vector.multi_reduction <maximumf>, %57, %cst_35 [1] : vector<8x128xf32> to vector<8xf32>
    %59 = vector.shape_cast %58 : vector<8xf32> to vector<8x1xf32>
    %60 = vector.broadcast %59 : vector<8x1xf32> to vector<8x128xf32>
    %61 = arith.subf %57, %60 : vector<8x128xf32>
    %62 = math.exp %61 : vector<8x128xf32>
    %cst_36 = arith.constant dense<0.000000e+00> : vector<8xf32>
    %63 = vector.multi_reduction <add>, %62, %cst_36 [1] : vector<8x128xf32> to vector<8xf32>
    %64 = vector.shape_cast %63 : vector<8xf32> to vector<8x1xf32>
    %cst_37 = arith.constant 1.000000e+00 : f32
    %65 = vector.broadcast %cst_37 : f32 to vector<8x1xf32>
    %66 = arith.divf %65, %64 : vector<8x1xf32>
    %67 = vector.broadcast %66 : vector<8x1xf32> to vector<8x128xf32>
    %68 = arith.mulf %62, %67 : vector<8x128xf32>
    %cst_38 = arith.constant 9.99999993E-9 : f32
    %69 = vector.broadcast %cst_38 : f32 to vector<8x128xf32>
    %70 = arith.addf %68, %69 : vector<8x128xf32>
    %71 = math.log %70 : vector<8x128xf32>
    %cst_39 = arith.constant 9.99999997E-7 : f32
    %72 = vector.broadcast %cst_39 : f32 to vector<8x128xf32>
    %73 = arith.maximumf %68, %72 : vector<8x128xf32>
    %cst_40 = arith.constant -13.8155107 : f32
    %74 = vector.broadcast %cst_40 : f32 to vector<8x128xf32>
    %75 = arith.maximumf %71, %74 : vector<8x128xf32>
    %76 = arith.subf %20, %71 : vector<8x128xf32>
    %77 = arith.mulf %19, %76 : vector<8x128xf32>
    %78 = arith.mulf %73, %75 : vector<8x128xf32>
    %cst_41 = arith.constant 5.000000e-02 : f32
    %79 = vector.broadcast %cst_41 : f32 to vector<8x128xf32>
    %80 = arith.mulf %79, %78 : vector<8x128xf32>
    %81 = arith.addf %77, %80 : vector<8x128xf32>
    %82 = vector.shape_cast %81 : vector<8x128xf32> to vector<1x8x128xf32>
    %cst_42 = arith.constant dense<0.000000e+00> : vector<1xf32>
    %83 = vector.multi_reduction <add>, %82, %cst_42 [1, 2] : vector<1x8x128xf32> to vector<1xf32>
    %84 = vector.shape_cast %83 : vector<1xf32> to vector<1x1x1xf32>
    %85 = vector.extract %84[0, 0, 0] : f32 from vector<1x1x1xf32>
    %cst_43 = arith.constant 1.250000e-01 : f32
    %86 = arith.mulf %85, %cst_43 : f32
    %c0_44 = arith.constant 0 : index
    %c0_45 = arith.constant 0 : index
    %87 = memref.load %arg3[%c0_44, %c0_45] : memref<1x1xf32, #tpu.memory_space<smem>>
    memref.store %86, %arg3[%c0_44, %c0_45] : memref<1x1xf32, #tpu.memory_space<smem>>
    return
  }
}

</mosaic_0001>

<bundles_post_ra>
// kernel: tpu_custom_call.1
= control target key start
LH: loop header
LB: loop body
LE: loop exit
PB: predicated region body
PF: predicated region fallthrough
CT: control target
= control target key end

     0   :  { %8 = vsyncpa [#allocation3], 0  ;;  %s294_s0 = inlined_call_operand.hbm [shape: f32[8,128], index: 0, kind: input, shape index: {}]   ;;  %s295_s1 = inlined_call_operand.hbm [shape: f32[8,128], index: 1, kind: input, shape index: {}]   ;;  %s296_s2 = inlined_call_operand.hbm [shape: f32[8,128], index: 2, kind: input, shape index: {}]   ;;  %s297_s3 = inlined_call_operand.hbm [shape: f32[1,1], index: 3, kind: output, shape index: {}]  }
   0x1   :  { %9 = vsyncpa [#allocation6], 0 }
   0x2   :  { %10 = vsyncpa [#allocation4], 0  ;;  %s257_s12 = smov [#allocation5]   ;;  %s258_s14 = smov [#allocation2]  }
   0x3   :  { %s27_s13 = sshll.u32 %s257_s12, 4  ;;  %s17_s15 = sshll.u32 %s258_s14, 4  ;;  %s28_s13 = int_to_ptr.vmem [resolvable:$true] %s27_s13  ;;  %s18_s15 = int_to_ptr.vmem [resolvable:$true] %s17_s15 }
   0x4   :  { %s191_s16 = scalar_lea.vmem %s28_s13, 128  ;;  %p196_p1 = scmp.lt.s32.totalorder %s28_s13, %s28_s13 }
   0x5   :  { %p192_p0 = scmp.ne.s32.totalorder %s28_s13, %s191_s16  ;;  %p197_p2 = scmp.lt.s32.totalorder %s191_s16, %s191_s16 }
   0x7   :  { %p198_p3 = por %p197_p2, %p196_p1 }
   0x9   :  { %p199_p4 = pnand %p198_p3, %p192_p0 }
   0xb   :  { %202 = shalt.err (!%p199_p4)
}
   0xc   :  { %30 = dma.hbm_to_vmem [thread:$0]  %s295_s1, 128, %s28_s13, [#allocation6]  }
   0xd   :  { %s211_s19 = scalar_lea.vmem %s18_s15, 128  ;;  %p216_p6 = scmp.lt.s32.totalorder %s18_s15, %s18_s15 }
   0xe   :  { %p212_p5 = scmp.ne.s32.totalorder %s18_s15, %s211_s19  ;;  %p217_p7 = scmp.lt.s32.totalorder %s211_s19, %s211_s19 }
  0x10   :  { %p218_p8 = por %p217_p7, %p216_p6 }
  0x12   :  { %p219_p9 = pnand %p218_p8, %p212_p5 }
  0x14   :  { %222 = shalt.err (!%p219_p9)
}
  0x15   :  { %20 = dma.hbm_to_vmem [thread:$0]  %s294_s0, 128, %s18_s15, [#allocation3]  }
  0x16   :  { %s259_s22 = smov [#allocation7]  }
  0x17   :  { %s37_s23 = sshll.u32 %s259_s22, 4  ;;  %s38_s23 = int_to_ptr.vmem [resolvable:$true] %s37_s23 }
  0x18   :  { %s231_s24 = scalar_lea.vmem %s38_s23, 128  ;;  %p236_p11 = scmp.lt.s32.totalorder %s38_s23, %s38_s23 }
  0x19   :  { %p232_p10 = scmp.ne.s32.totalorder %s38_s23, %s231_s24  ;;  %p237_p12 = scmp.lt.s32.totalorder %s231_s24, %s231_s24 }
  0x1b   :  { %p238_p13 = por %p237_p12, %p236_p11 }
  0x1d   :  { %p239_p0 = pnand %p238_p13, %p232_p10 }
  0x1f   :  { %242 = shalt.err (!%p239_p0)
}
  0x20   :  { %40 = dma.hbm_to_vmem [thread:$0]  %s296_s2, 128, %s38_s23, [#allocation6]  }
  0x21   :  { %251 = dma.done.wait [#allocation3], 128  }
  0x22   :  { %252 = vsyncadd [#allocation3], 4294967168 }
  0x23   :  { %253 = dma.done.wait [#allocation6], 256  }
  0x24   :  { %254 = vsyncadd [#allocation6], 4294967040  ;;  %v50_v0 = vld [vmem:[#allocation2] sm:$0xff]  ;;  %v51_v1 = vld [vmem:[#allocation5] sm:$0xff]  ;;  %s260_s5 = smov 0.01  }
  0x25   :  { %70 = vadd.xlane.f32.xlu0 %v50_v0  ;;  %v52_v13 = vld [vmem:[#allocation7] sm:$0xff]  ;;  %s261_s10 = smov [#allocation8]  }
  0x26   :  { %v67_v15 = vmul.f32 0.05, %v52_v13 }
  0x28   :  { %v68_v16 = vadd.f32 1.0, %v67_v15 }
  0x29   :  { %53 = vmax.xlane.f32.xlu0 %v51_v1 }
  0x2a   :  { %v69_v17 = vmul.f32 %v68_v16, %v50_v0 }
  0xae   :  { %v71_v2 = vpop.xlane.xlu0 %70 }
  0xaf   :  { %v72_v3 = vrot.slane %v71_v2, 4 }
  0xb1   :  { %v73_v4 = vadd.f32 %v72_v3, %v71_v2 }
  0xb2   :  { %v54_v11 = vpop.xlane.xlu0 %53 }
  0xb3   :  { %v74_v5 = vrot.slane %v73_v4, 2  ;;  %v55_v12 = vsub.f32 %v51_v1, %v54_v11 }
  0xb5   :  { %v75_v6 = vadd.f32 %v74_v5, %v73_v4  ;;  %v56_v14 = vmul.f32 1.442695, %v55_v12 }
  0xb7   :  { %v76_v7 = vrot.slane %v75_v6, 1 }
  0xb9   :  { %v77_v8 = vadd.f32 %v76_v7, %v75_v6 }
  0xbb   :  { %158 = vpush %v77_v8 }
  0xec   :  { %s159_s0 = spop %158 }
  0xed   :  { %s81_s26 = smul.f32 0.0009765625, %s159_s0 }
  0xef   :  { %p82_p1 = scmp.lt.f32.partialorder %s81_s26, 0.0  ;;  %s83_s2 = sceil.f32 %s81_s26 }
  0xf0   :  { %s84_s27 = sfloor.f32 %s81_s26 }
  0xf1   :  { %s299_s2 = smov (!%p82_p1, %s83_s2), %s84_s27 }
  0xf2   :  { %s86_s28 = sand.u32 2147483647, %s299_s2  ;;  %p101_p9 = scmp.lt.f32.partialorder %s299_s2, 0.0 }
  0xf3   :  { %p93_p2 = scmp.lt.f32.partialorder %s86_s28, 10000000.0  ;;  %p92_p3 = scmp.lt.f32.partialorder %s86_s28, 1000000.0 }
  0xf4   :  { %p91_p4 = scmp.lt.f32.partialorder %s86_s28, 100000.0  ;;  %p90_p5 = scmp.lt.f32.partialorder %s86_s28, 10000.0 }
  0xf5   :  { %s94_s29 = scalar_select %p93_p2, 1000000.0, 10000000.0 }
  0xf6   :  { %p89_p6 = scmp.lt.f32.partialorder %s86_s28, 1000.0  ;;  %p88_p7 = scmp.lt.f32.partialorder %s86_s28, 100.0 }
  0xf7   :  { %s301_s29 = smov (%p92_p3, %s94_s29), 100000.0  ;;  %p87_p8 = scmp.lt.f32.partialorder %s86_s28, 10.0 }
  0xf8   :  { %s303_s29 = smov (%p91_p4, %s301_s29), 10000.0 }
  0xf9   :  { %s305_s29 = smov (%p90_p5, %s303_s29), 1000.0 }
  0xfa   :  { %s307_s29 = smov (%p89_p6, %s305_s29), 100.0 }
  0xfb   :  { %s309_s29 = smov (%p88_p7, %s307_s29), 10.0 }
  0xfc   :  { %s311_s29 = smov (%p87_p8, %s309_s29), 1.0 }
  0xfd   :  { %s102_s30 = smul.f32 10.0, %s311_s29 }
  0xff   :  { %s313_s30 = smov (!%p101_p9, %s102_s30), %s311_s29 }
 0x100   :  { %s104_s4 = smul.f32 2.0, %s313_s30 }
 0x102   :  { %s105_s6 = smax.f32 %s260_s5, %s104_s4 }
 0x103   :  { %v106_v9 = vstv %s105_s6 }
 0x104   :  { %169 = vrcp.f32 %v106_v9 }
 0x105   :  { %171 = vpow2.f32 %v56_v14 }
 0x111   :  { %v170_v10 = vpop.eup %169 }
 0x112   :  { %160 = vpush %v170_v10  ;;  %v172_v20 = vpop.eup %171 }
 0x143   :  { %s161_s7 = spop %160 }
 0x144   :  { %v109_v18 = vstv %s161_s7 }
 0x145   :  { %v110_v19 = vmul.f32 %v109_v18, %v69_v17 }
 0x147   :  { %111 = vmax.xlane.f32.xlu1 %v110_v19 }
 0x14b   :  { %58 = vadd.xlane.f32.xlu1 %v172_v20 }
 0x1d0   :  { %v112_v21 = vpop.xlane.xlu1 %111 }
 0x1d1   :  { %v113_v22 = vsub.f32 %v110_v19, %v112_v21 }
 0x1d3   :  { %v114_v23 = vmul.f32 1.442695, %v113_v22 }
 0x1d4   :  { %v59_v25 = vpop.xlane.xlu1 %58 }
 0x1d5   :  { %173 = vpow2.f32 %v114_v23 }
 0x1d6   :  { %175 = vrcp.f32 %v59_v25 }
 0x1e2   :  { %v174_v24 = vpop.eup %173 }
 0x1e3   :  { %116 = vadd.xlane.f32.xlu0 %v174_v24  ;;  %v176_v27 = vpop.eup %175 }
 0x1e4   :  { %v62_v28 = vmul.f32 %v176_v27, %v172_v20 }
 0x1e6   :  { %v63_v29 = vmul.f32 0.95, %v62_v28 }
 0x1e8   :  { %v64_v30 = vadd.f32 0.000390625, %v63_v29 }
 0x26c   :  { %v117_v26 = vpop.xlane.xlu0 %116 }
 0x26d   :  { %177 = vrcp.f32 %v117_v26 }
 0x26e   :  { %179 = vlog2.f32 %v64_v30 }
 0x27a   :  { %v178_v31 = vpop.eup %177 }
 0x27b   :  { %v120_v32 = vmul.f32 %v178_v31, %v174_v24  ;;  %v180_v34 = vpop.eup %179 }
 0x27c   :  { %v66_v36 = vmul.f32 0.6931472, %v180_v34 }
 0x27d   :  { %v121_v33 = vadd.f32 1e-08, %v120_v32  ;;  %v124_v38 = vmax.f32 %v120_v32, 1e-06 }
 0x27f   :  { %181 = vlog2.f32 %v121_v33 }
 0x28c   :  { %v182_v35 = vpop.eup %181 }
 0x28d   :  { %v123_v37 = vmul.f32 0.6931472, %v182_v35 }
 0x28f   :  { %v125_v39 = vmax.f32 %v123_v37, -13.815511  ;;  %v126_v40 = vsub.f32 %v66_v36, %v123_v37 }
 0x291   :  { %v128_v41 = vmul.f32 %v125_v39, %v124_v38  ;;  %v127_v42 = vmul.f32 %v126_v40, %v64_v30 }
 0x293   :  { %v129_v43 = vmul.f32 0.05, %v128_v41 }
 0x295   :  { %v130_v44 = vadd.f32 %v129_v43, %v127_v42 }
 0x297   :  { %131 = vadd.xlane.f32.xlu1 %v130_v44 }
 0x320   :  { %v132_v45 = vpop.xlane.xlu1 %131 }
 0x321   :  { %v133_v46 = vrot.slane %v132_v45, 4 }
 0x323   :  { %v134_v47 = vadd.f32 %v133_v46, %v132_v45 }
 0x325   :  { %v135_v48 = vrot.slane %v134_v47, 2 }
 0x327   :  { %v136_v49 = vadd.f32 %v135_v48, %v134_v47 }
 0x329   :  { %v137_v50 = vrot.slane %v136_v49, 1 }
 0x32b   :  { %v138_v51 = vadd.f32 %v137_v50, %v136_v49 }
 0x32d   :  { %162 = vpush %v138_v51 }
 0x35e   :  { %s163_s8 = spop %162 }
 0x35f   :  { %s140_s9 = smul.f32 0.125, %s163_s8 }
 0x361   :  { %142 = sst [smem:[#allocation8]] %s140_s9 }
 0x362   :  { %150 = dma.smem_to_hbm %s261_s10, 16, %s297_s3, [#allocation4]  }
 0x363   :  { %255 = dma.done.wait [#allocation4], 16  }
 0x364   :  { %256 = vsyncadd [#allocation4], 4294967280 }
 0x365   :  { %154 = sfence }
 0x366   :  { %155 = vsyncpa [#allocation3], 1 }
 0x367   :  { %156 = vsyncpa [#allocation6], 1 }
 0x368   :  { %157 = vsyncpa [#allocation4], 1 }

</bundles_post_ra>
